<compile_context>
chip_gen: v7x
topology: tpu7x:2x2x1
jax: 0.10.0
libtpu: 0.0.40
codegen_flags: <defaults>
</compile_context>

<pallas_src>
import functools

import jax
import jax.numpy as jnp
from jax.experimental import pallas as pl
from jax.experimental.pallas import tpu as pltpu


def _label_smoothing_kernel(x_ref, t_ref, out_ref, *, confidence, smoothing,
                            n_valid, block_rows, inv_classes, upcast_f32):
    """One grid step: (TB, C) logits + (TB, 1) targets -> one (8, 128) partial-sum tile."""
    i = pl.program_id(0)
    row0 = i * block_rows

    x = x_ref[...]
    if upcast_f32:
        x = x.astype(jnp.float32)
    t = t_ref[...]                                              # (TB, 1) int32

    # Row max; it cancels in both loss terms, so work only with xm = x - m.
    m = jnp.max(x, axis=-1, keepdims=True)                      # (TB, 1)
    xm = x - m                                                  # (TB, C), <= 0

    # logsumexp(x) - m  == log(sum(exp(xm)))   (f32 accumulation for the reductions)
    sum_e = jnp.sum(jnp.exp(xm).astype(jnp.float32), axis=-1, keepdims=True)
    lse_m = jnp.log(sum_e)                                      # (TB, 1) f32

    # xm[target] via masked row-sum (exactly one nonzero per row); mean(xm) via row-sum.
    col = jax.lax.broadcasted_iota(jnp.int32, xm.shape, 1)
    xm_t = jnp.sum(jnp.where(col == t, xm, 0.0).astype(jnp.float32),
                   axis=-1, keepdims=True)                      # (TB, 1) f32
    xm_mean = jnp.sum(xm.astype(jnp.float32), axis=-1, keepdims=True) * inv_classes

    loss = ((confidence + smoothing) * lse_m
            - confidence * xm_t
            - smoothing * xm_mean)                              # (TB, 1) f32

    # Mask rows of the ragged last block (no HBM-side padding of x or target).
    rows = jax.lax.broadcasted_iota(jnp.int32, (block_rows, 1), 0) + row0
    loss = jnp.where(rows < n_valid, loss, 0.0)

    partial = jnp.sum(loss, axis=0, keepdims=True)              # (1, 1)
    out_ref[...] = jnp.broadcast_to(partial, (8, 128)).astype(jnp.float32)


def _round_up(a, b):
    return ((a + b - 1) // b) * b


def _tpu_vmem_capacity_bytes():
    try:
        info = pltpu.get_tpu_info()
        cap = getattr(info, "vmem_capacity_bytes", None)
        if cap:
            return int(cap)
    except Exception:
        pass
    return 64 * 1024 * 1024  # conservative default: v7x per-TensorCore VMEM


def label_smoothing_loss(x, target, smoothing=0.1, block_rows=None):
    """x: (N, C) float logits; target: (N,) int class indices in [0, C). Scalar mean loss."""
    n, c = x.shape
    itemsize = jnp.dtype(x.dtype).itemsize
    min_sub = max(8, 32 // itemsize)          # f32 -> 8, bf16 -> 16, int8/fp8 -> 32 sublanes

    # Generation-aware VMEM budgets (v5e/v6e: 128 MiB; v7x: 64 MiB per TensorCore).
    vmem_cap = _tpu_vmem_capacity_bytes()
    if vmem_cap >= 96 * 1024 * 1024:
        per_buffer_bytes = 8 * 1024 * 1024
        vmem_limit_bytes = 64 * 1024 * 1024
    else:
        per_buffer_bytes = 4 * 1024 * 1024
        vmem_limit_bytes = min(40 * 1024 * 1024, int(vmem_cap * 0.7))

    if block_rows is None:
        tb = per_buffer_bytes // (c * itemsize)
        tb = max(min_sub, (tb // min_sub) * min_sub)
        # Keep >= ~4 grid steps so the 'parallel' axis can shard across TensorCores
        # and the BlockSpec double-buffer pipeline stays filled.
        tb_grid = max(min_sub, _round_up(-(-n // 4), min_sub))
        tb = min(tb, tb_grid)
    else:
        tb = int(block_rows)
        assert tb == n or tb % min_sub == 0, \
            f"block_rows must equal N or be a multiple of {min_sub} for {x.dtype}"

    if tb >= n:
        tb = n                                 # single block covering the whole batch

    g = pl.cdiv(n, tb)                         # ragged last block handled in-kernel

    t2d = target.astype(jnp.int32).reshape(n, 1)
    upcast_f32 = (x.dtype != jnp.bfloat16)

    kernel = functools.partial(
        _label_smoothing_kernel,
        confidence=float(1.0 - smoothing),
        smoothing=float(smoothing),
        n_valid=int(n),
        block_rows=int(tb),
        inv_classes=1.0 / float(c),
        upcast_f32=upcast_f32,
    )

    partials = pl.pallas_call(
        kernel,
        out_shape=jax.ShapeDtypeStruct((g, 8, 128), jnp.float32),
        grid_spec=pltpu.PrefetchScalarGridSpec(
            num_scalar_prefetch=0,
            grid=(g,),
            in_specs=[
                # Large logits tile, full class extent on lanes.
                pl.BlockSpec((tb, c), lambda i: (i, 0)),
                # Per-step target sliver (O(TB) VMEM, not O(N)).
                pl.BlockSpec((tb, 1), lambda i: (i, 0)),
            ],
            # Distinct, lane-dense (8,128) output tile per step -> unmasked stores,
            # no serialized scalar accumulator; 'parallel' axis for megacore.
            out_specs=pl.BlockSpec((None, 8, 128), lambda i: (i, 0, 0)),
        ),
        compiler_params=pltpu.CompilerParams(
            dimension_semantics=("parallel",),
            vmem_limit_bytes=vmem_limit_bytes,
        ),
    )(x, t2d)

    # Each block wrote its partial sum replicated across an (8,128) tile; take one
    # element per block and finish the mean in JAX.
    return jnp.sum(partials[:, 0, 0]) / n


def _reference(x, target, smoothing):
    """Pure-JAX reference matching the PyTorch module."""
    confidence = 1.0 - smoothing
    logprobs = jax.nn.log_softmax(x, axis=-1)
    nll = -jnp.take_along_axis(logprobs, target[:, None], axis=-1)[:, 0]
    smooth = -jnp.mean(logprobs, axis=-1)
    return jnp.mean(confidence * nll + smoothing * smooth)


if __name__ == "__main__":
    key = jax.random.PRNGKey(0)
    k1, k2, k3, k4 = jax.random.split(key, 4)
    smoothing = 0.1

    # Case 1: small canonical shape (16 rows, 32 classes).
    N, C = 16, 32
    x = jax.random.normal(k1, (N, C), dtype=jnp.float32)
    target = jax.random.randint(k2, (N,), 0, C, dtype=jnp.int32)
    loss = jax.block_until_ready(label_smoothing_loss(x, target, smoothing=smoothing))
    ref = _reference(x, target, smoothing)
    assert jnp.allclose(loss, ref, atol=1e-4, rtol=1e-5), (loss, ref)

    # Case 2: non-aligned batch / classes, multi-block grid with a ragged last block
    # (exercises the no-pad path + in-kernel row masking).
    N2, C2 = 300, 200
    x2 = jax.random.normal(k3, (N2, C2), dtype=jnp.float32)
    target2 = jax.random.randint(k4, (N2,), 0, C2, dtype=jnp.int32)
    loss2 = jax.block_until_ready(
        label_smoothing_loss(x2, target2, smoothing=smoothing, block_rows=64))
    ref2 = _reference(x2, target2, smoothing)
    assert jnp.allclose(loss2, ref2, atol=1e-4, rtol=1e-5), (loss2, ref2)

    print("KERNEL_OK")
</pallas_src>

<mosaic_0001>
module attributes {stable_mosaic.version = 11 : i64} {
  func.func @_label_smoothing_kernel(%arg0: i32, %arg1: memref<8x32xf32, #tpu.memory_space<vmem>>, %arg2: memref<8x1xi32, #tpu.memory_space<vmem>>, %arg3: memref<1x8x128xf32, #tpu.memory_space<vmem>>) attributes {dimension_semantics = [#tpu.dimension_semantics<parallel>], iteration_bounds = array<i64: 2>, scalar_prefetch = 0 : i64, scratch_operands = 0 : i64, tpu.core_type = #tpu.core_type<tc>, window_params = [{transform_indices = @transform_0, window_bounds = array<i64: 8, 32>}, {transform_indices = @transform_1, window_bounds = array<i64: 8, 1>}, {transform_indices = @transform_2, window_bounds = array<i64: 1, 8, 128>}]} {
    %c8_i32 = arith.constant 8 : i32
    %0 = arith.muli %arg0, %c8_i32 : i32
    %c0 = arith.constant 0 : index
    %c0_0 = arith.constant 0 : index
    %1 = vector.load %arg1[%c0, %c0_0] : memref<8x32xf32, #tpu.memory_space<vmem>>, vector<8x32xf32>
    %c0_1 = arith.constant 0 : index
    %c0_2 = arith.constant 0 : index
    %2 = vector.load %arg2[%c0_1, %c0_2] : memref<8x1xi32, #tpu.memory_space<vmem>>, vector<8x1xi32>
    %cst = arith.constant dense<0xFF800000> : vector<8xf32>
    %3 = vector.multi_reduction <maximumf>, %1, %cst [1] : vector<8x32xf32> to vector<8xf32>
    %4 = vector.shape_cast %3 : vector<8xf32> to vector<8x1xf32>
    %5 = vector.broadcast %4 : vector<8x1xf32> to vector<8x32xf32>
    %6 = arith.subf %1, %5 : vector<8x32xf32>
    %7 = math.exp %6 : vector<8x32xf32>
    %cst_3 = arith.constant dense<0.000000e+00> : vector<8xf32>
    %8 = vector.multi_reduction <add>, %7, %cst_3 [1] : vector<8x32xf32> to vector<8xf32>
    %9 = vector.shape_cast %8 : vector<8xf32> to vector<8x1xf32>
    %10 = math.log %9 : vector<8x1xf32>
    %11 = tpu.iota {dimensions = array<i32: 1>} : vector<8x32xi32>
    %12 = vector.broadcast %2 : vector<8x1xi32> to vector<8x32xi32>
    %13 = arith.cmpi eq, %11, %12 : vector<8x32xi32>
    %cst_4 = arith.constant 0.000000e+00 : f32
    %14 = vector.broadcast %cst_4 : f32 to vector<8x32xf32>
    %15 = arith.select %13, %6, %14 : vector<8x32xi1>, vector<8x32xf32>
    %cst_5 = arith.constant dense<0.000000e+00> : vector<8xf32>
    %16 = vector.multi_reduction <add>, %15, %cst_5 [1] : vector<8x32xf32> to vector<8xf32>
    %17 = vector.shape_cast %16 : vector<8xf32> to vector<8x1xf32>
    %cst_6 = arith.constant dense<0.000000e+00> : vector<8xf32>
    %18 = vector.multi_reduction <add>, %6, %cst_6 [1] : vector<8x32xf32> to vector<8xf32>
    %19 = vector.shape_cast %18 : vector<8xf32> to vector<8x1xf32>
    %cst_7 = arith.constant 3.125000e-02 : f32
    %20 = vector.broadcast %cst_7 : f32 to vector<8x1xf32>
    %21 = arith.mulf %19, %20 : vector<8x1xf32>
    %cst_8 = arith.constant 1.000000e+00 : f32
    %22 = vector.broadcast %cst_8 : f32 to vector<8x1xf32>
    %23 = arith.mulf %22, %10 : vector<8x1xf32>
    %cst_9 = arith.constant 0.899999976 : f32
    %24 = vector.broadcast %cst_9 : f32 to vector<8x1xf32>
    %25 = arith.mulf %24, %17 : vector<8x1xf32>
    %26 = arith.subf %23, %25 : vector<8x1xf32>
    %cst_10 = arith.constant 1.000000e-01 : f32
    %27 = vector.broadcast %cst_10 : f32 to vector<8x1xf32>
    %28 = arith.mulf %27, %21 : vector<8x1xf32>
    %29 = arith.subf %26, %28 : vector<8x1xf32>
    %30 = tpu.iota {dimensions = array<i32: 0>} : vector<8x1xi32>
    %31 = vector.broadcast %0 : i32 to vector<8x1xi32>
    %32 = arith.addi %30, %31 : vector<8x1xi32>
    %c16_i32 = arith.constant 16 : i32
    %33 = vector.broadcast %c16_i32 : i32 to vector<8x1xi32>
    %34 = arith.cmpi slt, %32, %33 : vector<8x1xi32>
    %cst_11 = arith.constant 0.000000e+00 : f32
    %35 = vector.broadcast %cst_11 : f32 to vector<8x1xf32>
    %36 = arith.select %34, %29, %35 : vector<8x1xi1>, vector<8x1xf32>
    %cst_12 = arith.constant dense<0.000000e+00> : vector<1xf32>
    %37 = vector.multi_reduction <add>, %36, %cst_12 [0] : vector<8x1xf32> to vector<1xf32>
    %38 = vector.shape_cast %37 : vector<1xf32> to vector<1x1xf32>
    %39 = vector.shape_cast %38 : vector<1x1xf32> to vector<1x1xf32>
    %40 = vector.broadcast %39 : vector<1x1xf32> to vector<8x128xf32>
    %c0_13 = arith.constant 0 : index
    %c0_14 = arith.constant 0 : index
    %c0_15 = arith.constant 0 : index
    %41 = vector.load %arg3[%c0_13, %c0_14, %c0_15] : memref<1x8x128xf32, #tpu.memory_space<vmem>>, vector<1x8x128xf32>
    %42 = vector.shape_cast %41 : vector<1x8x128xf32> to vector<8x128xf32>
    %43 = vector.shape_cast %40 : vector<8x128xf32> to vector<1x8x128xf32>
    tpu.vector_store %arg3[%c0_13, %c0_14, %c0_15], %43 {strides = array<i32>} : memref<1x8x128xf32, #tpu.memory_space<vmem>>, vector<1x8x128xf32>,
    return
  }
  func.func @transform_0(%arg0: i32) -> (i32, i32) {
    %c0_i32 = arith.constant 0 : i32
    %c0_i32_0 = arith.constant 0 : i32
    return %arg0, %c0_i32 : i32, i32
  }
  func.func @transform_1(%arg0: i32) -> (i32, i32) {
    %c0_i32 = arith.constant 0 : i32
    %c0_i32_0 = arith.constant 0 : i32
    return %arg0, %c0_i32 : i32, i32
  }
  func.func @transform_2(%arg0: i32) -> (i32, i32, i32) {
    %c0_i32 = arith.constant 0 : i32
    %c0_i32_0 = arith.constant 0 : i32
    %c0_i32_1 = arith.constant 0 : i32
    return %arg0, %c0_i32, %c0_i32_0 : i32, i32, i32
  }
}

</mosaic_0001>

<bundles_post_ra>
// kernel: tpu_custom_call.1
= control target key start
LH: loop header
LB: loop body
LE: loop exit
PB: predicated region body
PF: predicated region fallthrough
CT: control target
= control target key end

     0   :  { %7 = vsyncpa [#allocation3], 0  ;;  %s533_s0 = inlined_call_operand.vmem [shape: f32[16,32], index: 0, kind: input, shape index: {}]   ;;  %s534_s1 = inlined_call_operand.vmem [shape: s32[16,1], index: 1, kind: input, shape index: {}]   ;;  %s535_s2 = inlined_call_operand.hbm [shape: f32[2,8,128], index: 2, kind: output, shape index: {}]  }
   0x1   :  { %9 = vsyncpa [#allocation3 + $0x1], 0  ;;  %s425_s9 = smov 0   ;;  %s427_s10 = smov 0  }
   0x2   :  { %s429_s11 = smov 0   ;;  %s431_s12 = smov 0  }
   0x3 LB: > { %s446_s13 = sadd.s32 4294967295, %s406_s12   ;;  %s287_s14 = sadd.s32 4294967294, %s406_s12   ;;  %s406_s12 = sphi %s431_s12, %s541_s12   ;;  %s402_s11 = sphi %s429_s11, %s540_s11   ;;  %s398_s10 = sphi %s427_s10, %s539_s10   ;;  %s394_s9 = sphi %s425_s9, %s538_s9  }
   0x4   : > { %s450_s15 = sadd.s32 1, %s406_s12   ;;  %s74_s16 = sadd.s32 1, %s402_s11 }
   0x5   : > { %s71_s17 = ssub.s32 %s406_s12, %s450_s15  ;;  %p84_p0 = scmp.ne.s32.totalorder %s402_s11, %s398_s10 }
   0x6   : > { %p72_p1 = scmp.eq.s32.totalorder %s71_s17, 0  ;;  %p85_p2 = scmp.eq.s32.totalorder %s446_s13, 1 }
   0x7   : > { %p90_p3 = scmp.ne.s32.totalorder %s398_s10, %s394_s9  ;;  %p91_p4 = scmp.eq.s32.totalorder %s287_s14, 1 }
   0x8   : > { %s461_s18 = scalar_select %p72_p1, %s402_s11, %s74_s16  }
   0x9   : > { %p463_p5 = por %p85_p2, %p84_p0  ;;  %p467_p6 = por %p91_p4, %p90_p3 }
   0xa   : > { %p290_p7 = scmp.ge.s32.totalorder %s406_s12, 1  ;;  %p123_p8 = scmp.lt.s32.totalorder %s406_s12, 3 }
   0xc   : > { %p124_p9 = pnand %p290_p7, %p123_p8 }
   0xd   : > { %p148_p10 = scmp.lt.s32.totalorder (!%p124_p9), %s446_s13, 1  ;;  %v408_v0 = vmov (!%p124_p9), 0   ;;  %vm159_vm0 = vcmask (!%p124_p9), 261120   ;;  %v171_v7 = vlaneseq (!%p124_p9)  ;;  %s294_s29 = sshll.u32 (!%p124_p9), %s446_s13, 3 }
   0xe   : > { %127 = sbr.rel (%p124_p9) target bundleno = 371 (0x173), region = 28  ;;  %339 = vset.pattern.permute.xlu0 (!%p124_p9), %v408_v0  ;;  %v191_v18 = vstv (!%p124_p9), %s294_s29  ;;  %s145_s30 = sand.u32 (!%p124_p9), 1, %s398_s10  }
   0xf   : > { %v172_v8 = vand.u32 (!%p124_p9), 127, %v171_v7  ;;  %v190_v17 = vshrl.u32 (!%p124_p9), %v171_v7, 7  ;;  %s291_s3 = sshll.u32 (!%p124_p9), %s145_s30, 3  ;;  %s296_s4 = sshll.u32 (!%p124_p9), %s446_s13, 7 }
  0x10   : > { %s147_s5 = scalar_lea.vmem (!%p124_p9), [#allocation2], %s291_s3  ;;  %s491_s14 = scalar_lea.hbm (!%p124_p9), %s535_s2, %s296_s4 }
  0x11   : > { %v192_v22 = vadd.s32 (!%p124_p9), %v191_v18, %v190_v17  ;;  %s216_s6 = sshll.u32 (!%p124_p9), %s147_s5, 4  ;;  %s203_s16 = scalar_lea.sflag (!%p124_p9), [#allocation3], %s145_s30  ;;  %s493_s6 = int_to_ptr.vmem [resolvable:$true] %s216_s6 }
  0x12   : > { %s344_s17 = scalar_lea.vmem (!%p124_p9), %s493_s6, 128 }
  0x13   : > { %vm193_vm2 = vcmp.lt.s32.totalorder (!%p124_p9), %v192_v22, 16  ;;  %p345_p11 = scmp.ne.s32.totalorder (!%p124_p9), %s493_s6, %s344_s17 }
  0x15   : > { %s149_s21 = scalar_select %p148_p10, %s446_s13, 1 }
  0x16   : > { %p346_p12 = pnand %p345_p11, %p463_p5  ;;  %s409_s13 = smov [#allocation2]  }
  0x17   : > { %s292_s22 = sshll.u32 %s149_s21, 3  ;;  %s348_s21 = sshll.u32 %s409_s13, 4  ;;  %s349_s21 = int_to_ptr.vmem [resolvable:$false] %s348_s21 }
  0x18   : > { %s151_s25 = scalar_lea.vmem %s533_s0, %s292_s22  ;;  %s155_s28 = scalar_lea.vmem %s534_s1, %s292_s22 }
  0x19   : > { %v157_v1 = vld [vmem:[%s151_s25] sm:$0xff]  ;;  %p347_p13 = pneg %p346_p12  ;;  %s350_s22 = scalar_lea.vmem %s349_s21, 256 }
  0x1a   : > { %v160_v2 = vsel %vm159_vm0, %v157_v1, -inf  ;;  %v158_v3 = vld [vmem:[%s155_s28] sm:$0xff]  ;;  %p351_p0 = scmp.lt.s32.totalorder %s493_s6, %s349_s21  ;;  %p352_p1 = scmp.lt.s32.totalorder %s350_s22, %s344_s17 }
  0x1b   : > { %161 = vmax.xlane.f32.xlu0 %v160_v2 }
  0x1c   : > { %p353_p2 = por %p352_p1, %p351_p0 }
  0x1e   : > { %p354_p3 = pnand %p353_p2, %p347_p13 }
  0x31   : > { %174 = vperm.xlu0 %339, %v158_v3  }
  0xa8   : > { %v162_v4 = vpop.xlane.xlu0 %161 }
  0xa9   : > { %v163_v5 = vsub.f32 %v157_v1, %v162_v4 }
  0xab   : > { %v164_v6 = vmul.f32 1.442695, %v163_v5  ;;  %v181_v14 = vsel %vm159_vm0, %v163_v5, 0.0 }
  0xad   : > { %340 = vpow2.f32 %v164_v6 }
  0xb0   : > { %v175_v9 = vpop.permute.xlu0 %174 }
  0xb1   : > { %vm176_vm1 = vcmp.eq.s32.totalorder %v172_v8, %v175_v9 }
  0xb2   : > { %v177_v12 = vsel %vm176_vm1, %v163_v5, 0.0 }
  0xb3   : > { %v178_v13 = vsel %vm159_vm0, %v177_v12, 0.0 }
  0xb7   : > { %v341_v10 = vpop.eup %340 }
  0xb8   : > { %v166_v11 = vsel %vm159_vm0, %v341_v10, 0.0 }
  0xb9   : > { %167 = vadd.xlane.f32.xlu1 %v166_v11 }
  0xbd   : > { %179 = vadd.xlane.f32.xlu1 %v178_v13 }
  0xc1   : > { %182 = vadd.xlane.f32.xlu1 %v181_v14 }
 0x146   : > { %v168_v15 = vpop.xlane.xlu1 %167 }
 0x147   : > { %342 = vlog2.f32 %v168_v15 }
 0x14a   : > { %v180_v16 = vpop.xlane.xlu1 %179 }
 0x14b   : > { %v185_v24 = vmul.f32 0.9, %v180_v16 }
 0x14e   : > { %v183_v19 = vpop.xlane.xlu1 %182 }
 0x14f   : > { %v184_v20 = vmul.f32 0.03125, %v183_v19 }
 0x151   : > { %v343_v21 = vpop.eup %342  ;;  %v187_v26 = vmul.f32 0.1, %v184_v20 }
 0x152   : > { %v170_v23 = vmul.f32 0.6931472, %v343_v21 }
 0x154   : > { %v186_v25 = vsub.f32 %v170_v23, %v185_v24 }
 0x156   : > { %v188_v27 = vsub.f32 %v186_v25, %v187_v26 }
 0x158   : > { %v194_v28 = vsel %vm193_vm2, %v188_v27, 0.0 }
 0x159   : > { %v195_v29 = vrot.slane %v194_v28, 4 }
 0x15b   : > { %v196_v30 = vadd.f32 %v195_v29, %v194_v28 }
 0x15d   : > { %v197_v31 = vrot.slane %v196_v30, 2 }
 0x15f   : > { %v198_v32 = vadd.f32 %v197_v31, %v196_v30 }
 0x161   : > { %v199_v33 = vrot.slane %v198_v32, 1 }
 0x163   : > { %v200_v34 = vadd.f32 %v199_v33, %v198_v32 }
 0x165   : > { %201 = vst [vmem:[%s147_s5] sm:$0xff] %v200_v34 }
 0x166   : > { %357 = shalt.err (!%p354_p3)
}
 0x167   : > { %s358_s23 = scalar_lea.hbm %s491_s14, 128  ;;  %s362_s26 = scalar_lea.hbm %s535_s2, 256 }
 0x168   : > { %p359_p4 = scmp.ne.s32.totalorder %s491_s14, %s358_s23  ;;  %p363_p9 = scmp.lt.u32.totalorder %s491_s14, %s535_s2 }
 0x169   : > { %p364_p10 = scmp.lt.u32.totalorder %s362_s26, %s358_s23  ;;  %p366_p12 = scmp.lt.u32.totalorder %s358_s23, %s491_s14 }
 0x16a   : > { %p360_p7 = pnand %p359_p4, %p463_p5 }
 0x16b   : > { %p365_p11 = por %p364_p10, %p363_p9 }
 0x16c   : > { %p361_p8 = pneg %p360_p7 }
 0x16d   : > { %p367_p13 = por %p366_p12, %p365_p11 }
 0x16f   : > { %p368_p0 = pnand %p367_p13, %p361_p8 }
 0x171   : > { %371 = shalt.err (!%p368_p0)
}
 0x172   : > { %299 = dma.vmem_to_hbm [thread:$0]  (%p463_p5), %s493_s6, 128, %s491_s14, %s203_s16  }
 0x173 PF: > { %p305_p1 = scmp.ge.s32.totalorder %s406_s12, 2  ;;  %s228_s29 = sand.u32 1, %s394_s9  }
 0x174   : > { %s229_s30 = scalar_lea.sflag [#allocation3], %s228_s29 }
 0x175   : > { %p302_p2 = pnand %p305_p1, %p467_p6 }
 0x177   : > { %389 = dma.done.wait (!%p302_p2), %s229_s30, 128  }
 0x178   : > { %391 = vsyncadd (!%p302_p2), %s229_s30, 4294967168  ;;  %p12_p3 = scmp.ge.s32.totalorder %s450_s15, 4   ;;  %s538_s9 = smov %s398_s10 }
 0x179   : > { %s539_s10 = smov %s402_s11  ;;  %s540_s11 = smov %s461_s18 }
 0x17a   : > { %s541_s12 = smov %s450_s15  ;;  %14 = sbr.rel (!%p12_p3) target bundleno = 3 (0x3), region = 66 }
 0x181   :  { %234 = vsyncpa [#allocation3], 1 }
 0x182   :  { %236 = vsyncpa [#allocation3 + $0x1], 1 }

</bundles_post_ra>
